<compile_context>
chip_gen: v6e
topology: v6e:2x2x1
jax: 0.10.0
libtpu: 0.0.40
codegen_flags: <defaults>
</compile_context>

<pallas_src>
import functools
import math

import jax
import jax.numpy as jnp
from jax import lax
from jax.experimental import pallas as pl
from jax.experimental.pallas import tpu as pltpu


def _round_up(x, m):
    return ((x + m - 1) // m) * m


# ----------------------------------------------------------------------------
# Kernel: one grid step == one timestep of the recurrence.
# ----------------------------------------------------------------------------
def eernnm_seq_kernel(xr_ref, h0_ref, wx_ref, wh_ref, b_ref,
                      score_ref, hout_ref, *, gate_pad):
    t = pl.program_id(0)
    G = gate_pad                                   # 128-aligned gate width

    # Initialize the resident hidden-state output block from h0 at t == 0.
    @pl.when(t == 0)
    def _():
        hout_ref[...] = h0_ref[...]

    xr = xr_ref[0]                                 # [8, F2_pad]  (x_top | x_bot)
    h_prev = hout_ref[...]                         # [8, G]       h_{t-1} (padded)

    # Two MXU passes against fused, gate-aligned weights.
    gx = jnp.dot(xr, wx_ref[...], preferred_element_type=jnp.float32)      # [8,5G]
    ghh = jnp.dot(h_prev, wh_ref[...], preferred_element_type=jnp.float32)  # [8,5G]
    g = gx + ghh + b_ref[...]                      # [8, 5G]

    # Lane-block layout: [0:G]=r gate, [G:2G]=z gate, [2G:3G]=gi_n,
    #                    [3G:4G]=gh_n, [4G:5G]=score (col 0 valid).
    r_g = jax.nn.sigmoid(g[:, 0:G])
    z_g = jax.nn.sigmoid(g[:, G:2 * G])
    n_g = jnp.tanh(g[:, 2 * G:3 * G] + r_g * g[:, 3 * G:4 * G])

    # score uses h_{t-1} (computed above, before the GRU update) -- matches
    # the PyTorch forward ordering.
    score_ref[0] = g[:, 4 * G:5 * G]               # lane-dense [8, G] slab
    hout_ref[...] = (1.0 - z_g) * n_g + z_g * h_prev


# ----------------------------------------------------------------------------
# Parameter init (matches nn.GRU / nn.Linear default shapes) and one-time
# parameter preparation (transpose / split / pad / fuse).
# ----------------------------------------------------------------------------
def init_params(key, text_feature_size, rnn_hidden_size):
    F, H = text_feature_size, rnn_hidden_size
    ks = jax.random.split(key, 6)
    kg = 1.0 / math.sqrt(H)
    w_ih = jax.random.uniform(ks[0], (3 * H, 2 * F), jnp.float32, -kg, kg)
    w_hh = jax.random.uniform(ks[1], (3 * H, H), jnp.float32, -kg, kg)
    b_ih = jax.random.uniform(ks[2], (3 * H,), jnp.float32, -kg, kg)
    b_hh = jax.random.uniform(ks[3], (3 * H,), jnp.float32, -kg, kg)
    kl = 1.0 / math.sqrt(H + F)
    w_s = jax.random.uniform(ks[4], (1, H + F), jnp.float32, -kl, kl)
    b_s = jax.random.uniform(ks[5], (1,), jnp.float32, -kl, kl)
    return dict(w_ih=w_ih, w_hh=w_hh, b_ih=b_ih, b_hh=b_hh, w_s=w_s, b_s=b_s)


def prepare_params(params, text_feature_size, rnn_hidden_size):
    """One-time fusion of all weights into two gate-aligned matrices + bias."""
    F, H = text_feature_size, rnn_hidden_size
    G = _round_up(H, 128)                # padded gate width (lane aligned)
    F2 = _round_up(max(2 * F, 1), 128)   # padded [x_top, x_bot] width
    N = 5 * G

    w_ih_t = params['w_ih'].T            # [2F, 3H]
    w_hh_t = params['w_hh'].T            # [H, 3H]
    w_s = params['w_s']                  # [1, F+H]  (first F cols act on X)
    b_ih, b_hh, b_s = params['b_ih'], params['b_hh'], params['b_s']

    wx = jnp.zeros((F2, N), jnp.float32)
    wx = wx.at[:2 * F, 0:H].set(w_ih_t[:, 0:H])                 # r gate
    wx = wx.at[:2 * F, G:G + H].set(w_ih_t[:, H:2 * H])         # z gate
    wx = wx.at[:2 * F, 2 * G:2 * G + H].set(w_ih_t[:, 2 * H:])  # gi_n
    # score: x_top + x_bot == X exactly, so put w_s_x in both halves.
    wx = wx.at[:F, 4 * G].set(w_s[0, :F])
    wx = wx.at[F:2 * F, 4 * G].set(w_s[0, :F])

    wh = jnp.zeros((G, N), jnp.float32)
    wh = wh.at[:H, 0:H].set(w_hh_t[:, 0:H])                     # r gate
    wh = wh.at[:H, G:G + H].set(w_hh_t[:, H:2 * H])             # z gate
    wh = wh.at[:H, 3 * G:3 * G + H].set(w_hh_t[:, 2 * H:])      # gh_n
    wh = wh.at[:H, 4 * G].set(w_s[0, F:F + H])                  # score h-part

    b = jnp.zeros((N,), jnp.float32)
    b = b.at[0:H].set(b_ih[0:H] + b_hh[0:H])
    b = b.at[G:G + H].set(b_ih[H:2 * H] + b_hh[H:2 * H])
    b = b.at[2 * G:2 * G + H].set(b_ih[2 * H:3 * H])
    b = b.at[3 * G:3 * G + H].set(b_hh[2 * H:3 * H])
    b = b.at[4 * G].set(b_s[0])
    b = jnp.tile(b[None, :], (8, 1))                            # [8, N]

    return dict(wx=wx, wh=wh, b=b)


# ----------------------------------------------------------------------------
# Wrappers
# ----------------------------------------------------------------------------
def eernnm_forward_seq(Xs, rs, h0, prep, rnn_hidden_size):
    """Run T timesteps of EERNNMSeqModel.forward inside one pallas_call.

    Xs: [T, F], rs: [T] (0/1 floats), h0: [1, H] or None.
    Returns (scores [T], h_final [1, H]).
    """
    T, F = Xs.shape
    H = rnn_hidden_size
    F2 = prep['wx'].shape[0]
    G = prep['wh'].shape[0]
    N = prep['wx'].shape[1]

    # Fold X/r into the per-step GRU input row [X*c, X*(1-c)] ahead of time
    # (only the h-dependent part of the layer must stay inside the kernel).
    c = (rs.reshape(T, 1) >= 0.5).astype(jnp.float32)
    xr_rows = jnp.concatenate([Xs * c, Xs * (1.0 - c)], axis=1)       # [T, 2F]
    xr = jnp.zeros((T, 8, F2), jnp.float32).at[:, 0, :2 * F].set(xr_rows)

    if h0 is None:
        h0 = jnp.zeros((1, H), jnp.float32)
    h0p = jnp.zeros((8, G), jnp.float32).at[0, :H].set(h0[0])

    kernel = functools.partial(eernnm_seq_kernel, gate_pad=G)

    grid_spec = pltpu.PrefetchScalarGridSpec(
        num_scalar_prefetch=0,
        grid=(T,),
        in_specs=[
            pl.BlockSpec((1, 8, F2), lambda t: (t, 0, 0)),   # streamed x_r
            pl.BlockSpec((8, G), lambda t: (0, 0)),          # h0 (resident)
            pl.BlockSpec((F2, N), lambda t: (0, 0)),         # W_x (resident)
            pl.BlockSpec((G, N), lambda t: (0, 0)),          # W_h (resident)
            pl.BlockSpec((8, N), lambda t: (0, 0)),          # fused bias
        ],
        out_specs=(
            pl.BlockSpec((1, 8, G), lambda t: (t, 0, 0)),    # per-step scores
            pl.BlockSpec((8, G), lambda t: (0, 0)),          # resident h state
        ),
    )

    scores_pad, h_pad = pl.pallas_call(
        kernel,
        out_shape=(jax.ShapeDtypeStruct((T, 8, G), jnp.float32),
                   jax.ShapeDtypeStruct((8, G), jnp.float32)),
        grid_spec=grid_spec,
        compiler_params=pltpu.CompilerParams(
            dimension_semantics=("arbitrary",)),
    )(xr, h0p, prep['wx'], prep['wh'], prep['b'])

    # TODO(synk): scores are emitted into a padded [T,8,128] slab for unmasked
    # stores; compact to [T] here on the host side.
    scores = scores_pad[:, 0, 0]          # [T]
    h_final = h_pad[0:1, :H]              # [1, H]
    return scores, h_final


def eernnm_forward(X, r, h, prep, rnn_hidden_size):
    """Single-step forward matching EERNNMSeqModel.forward signature."""
    r1 = jnp.asarray(r, jnp.float32).reshape(1)
    scores, h_new = eernnm_forward_seq(X.reshape(1, -1), r1, h, prep,
                                       rnn_hidden_size)
    return scores, h_new                  # scores: [1] == score.squeeze(0)


# ----------------------------------------------------------------------------
# Pure-JAX reference mirroring the PyTorch module exactly.
# ----------------------------------------------------------------------------
def reference_step(X, r, h, params):
    p = params
    hp = lax.Precision.HIGHEST
    pred_X = jnp.concatenate([X, h], axis=1)
    score = jnp.dot(pred_X, p['w_s'].T, precision=hp) + p['b_s']
    zeros = jnp.zeros_like(X)
    x_r = jnp.where(r >= 0.5,
                    jnp.concatenate([X, zeros], axis=1),
                    jnp.concatenate([zeros, X], axis=1))
    gi = jnp.dot(x_r, p['w_ih'].T, precision=hp) + p['b_ih']
    gh = jnp.dot(h, p['w_hh'].T, precision=hp) + p['b_hh']
    H = h.shape[1]
    r_g = jax.nn.sigmoid(gi[:, 0:H] + gh[:, 0:H])
    z_g = jax.nn.sigmoid(gi[:, H:2 * H] + gh[:, H:2 * H])
    n_g = jnp.tanh(gi[:, 2 * H:3 * H] + r_g * gh[:, 2 * H:3 * H])
    h_new = (1.0 - z_g) * n_g + z_g * h
    return score[0], h_new


def reference_seq(Xs, rs, h0, params):
    h = h0
    scores = []
    for t in range(Xs.shape[0]):
        s, h = reference_step(Xs[t:t + 1], rs[t:t + 1], h, params)
        scores.append(s[0])
    return jnp.stack(scores), h


# ----------------------------------------------------------------------------
if __name__ == "__main__":
    text_feature_size = 32
    rnn_hidden_size = 32
    T = 8

    key = jax.random.PRNGKey(0)
    kp, kx, kh = jax.random.split(key, 3)
    params = init_params(kp, text_feature_size, rnn_hidden_size)
    prep = prepare_params(params, text_feature_size, rnn_hidden_size)

    Xs = jax.random.normal(kx, (T, text_feature_size), jnp.float32)
    rs = jnp.array([1., 0., 1., 1., 0., 0., 1., 0.], jnp.float32)
    h0 = jax.random.normal(kh, (1, rnn_hidden_size), jnp.float32)

    # Sequence-fused kernel (the main path).
    scores, h_final = eernnm_forward_seq(Xs, rs, h0, prep, rnn_hidden_size)
    jax.block_until_ready((scores, h_final))

    scores_ref, h_ref = reference_seq(Xs, rs, h0, params)
    assert jnp.allclose(scores, scores_ref, atol=2e-4, rtol=2e-4), (
        scores, scores_ref)
    assert jnp.allclose(h_final, h_ref, atol=2e-4, rtol=2e-4)

    # Single-step path (module signature), both r branches.
    for rv in (1.0, 0.0):
        s1, h1 = eernnm_forward(Xs[0:1], jnp.array([rv], jnp.float32), h0,
                                prep, rnn_hidden_size)
        jax.block_until_ready((s1, h1))
        s1_ref, h1_ref = reference_step(Xs[0:1], jnp.array([rv], jnp.float32),
                                        h0, params)
        assert jnp.allclose(s1, s1_ref, atol=2e-4, rtol=2e-4)
        assert jnp.allclose(h1, h1_ref, atol=2e-4, rtol=2e-4)

    print("KERNEL_OK")
</pallas_src>

<mosaic_0001>
module attributes {stable_mosaic.version = 11 : i64} {
  func.func @eernnm_seq_kernel(%arg0: i32, %arg1: memref<1x8x128xf32, #tpu.memory_space<vmem>>, %arg2: memref<8x128xf32, #tpu.memory_space<vmem>>, %arg3: memref<128x640xf32, #tpu.memory_space<vmem>>, %arg4: memref<128x640xf32, #tpu.memory_space<vmem>>, %arg5: memref<8x640xf32, #tpu.memory_space<vmem>>, %arg6: memref<1x8x128xf32, #tpu.memory_space<vmem>>, %arg7: memref<8x128xf32, #tpu.memory_space<vmem>>) attributes {dimension_semantics = [#tpu.dimension_semantics<arbitrary>], iteration_bounds = array<i64: 8>, scalar_prefetch = 0 : i64, scratch_operands = 0 : i64, tpu.core_type = #tpu.core_type<tc>, window_params = [{transform_indices = @transform_0, window_bounds = array<i64: 1, 8, 128>}, {pipeline_mode = #tpu.pipeline_mode<synchronous>, transform_indices = @transform_1, window_bounds = array<i64: 8, 128>}, {pipeline_mode = #tpu.pipeline_mode<synchronous>, transform_indices = @transform_2, window_bounds = array<i64: 128, 640>}, {pipeline_mode = #tpu.pipeline_mode<synchronous>, transform_indices = @transform_3, window_bounds = array<i64: 128, 640>}, {pipeline_mode = #tpu.pipeline_mode<synchronous>, transform_indices = @transform_4, window_bounds = array<i64: 8, 640>}, {transform_indices = @transform_5, window_bounds = array<i64: 1, 8, 128>}, {pipeline_mode = #tpu.pipeline_mode<synchronous>, transform_indices = @transform_6, window_bounds = array<i64: 8, 128>}]} {
    %c0_i32 = arith.constant 0 : i32
    %0 = arith.cmpi eq, %arg0, %c0_i32 : i32
    %1 = arith.extui %0 : i1 to i32
    %c0_i32_0 = arith.constant 0 : i32
    %2 = arith.cmpi ne, %1, %c0_i32_0 : i32
    scf.if %2 {
      %c0_20 = arith.constant 0 : index
      %c0_21 = arith.constant 0 : index
      %40 = vector.load %arg2[%c0_20, %c0_21] : memref<8x128xf32, #tpu.memory_space<vmem>>, vector<8x128xf32>
      %c0_22 = arith.constant 0 : index
      %c0_23 = arith.constant 0 : index
      %41 = vector.load %arg7[%c0_22, %c0_23] : memref<8x128xf32, #tpu.memory_space<vmem>>, vector<8x128xf32>
      tpu.vector_store %arg7[%c0_22, %c0_23], %40 {strides = array<i32>} : memref<8x128xf32, #tpu.memory_space<vmem>>, vector<8x128xf32>,
    } else {
    }
    %c0 = arith.constant 0 : index
    %c0_1 = arith.constant 0 : index
    %c0_2 = arith.constant 0 : index
    %3 = vector.load %arg1[%c0, %c0_1, %c0_2] : memref<1x8x128xf32, #tpu.memory_space<vmem>>, vector<1x8x128xf32>
    %4 = vector.shape_cast %3 : vector<1x8x128xf32> to vector<8x128xf32>
    %c0_3 = arith.constant 0 : index
    %c0_4 = arith.constant 0 : index
    %5 = vector.load %arg7[%c0_3, %c0_4] : memref<8x128xf32, #tpu.memory_space<vmem>>, vector<8x128xf32>
    %c0_5 = arith.constant 0 : index
    %c0_6 = arith.constant 0 : index
    %6 = vector.load %arg3[%c0_5, %c0_6] : memref<128x640xf32, #tpu.memory_space<vmem>>, vector<128x640xf32>
    %cst = arith.constant dense<0.000000e+00> : vector<8x640xf32>
    %7 = tpu.matmul %4, %6, %cst {dimension_numbers = #tpu.dot_dimension_numbers<[1], [0], [0], [1], [0, 0, 1, 1], [], []>} : vector<8x128xf32>, vector<128x640xf32>, vector<8x640xf32> -> vector<8x640xf32>
    %c0_7 = arith.constant 0 : index
    %c0_8 = arith.constant 0 : index
    %8 = vector.load %arg4[%c0_7, %c0_8] : memref<128x640xf32, #tpu.memory_space<vmem>>, vector<128x640xf32>
    %cst_9 = arith.constant dense<0.000000e+00> : vector<8x640xf32>
    %9 = tpu.matmul %5, %8, %cst_9 {dimension_numbers = #tpu.dot_dimension_numbers<[1], [0], [0], [1], [0, 0, 1, 1], [], []>} : vector<8x128xf32>, vector<128x640xf32>, vector<8x640xf32> -> vector<8x640xf32>
    %10 = arith.addf %7, %9 : vector<8x640xf32>
    %c0_10 = arith.constant 0 : index
    %c0_11 = arith.constant 0 : index
    %11 = vector.load %arg5[%c0_10, %c0_11] : memref<8x640xf32, #tpu.memory_space<vmem>>, vector<8x640xf32>
    %12 = arith.addf %10, %11 : vector<8x640xf32>
    %13 = vector.extract_strided_slice %12 {offsets = [0, 0], sizes = [8, 128], strides = [1, 1]} : vector<8x640xf32> to vector<8x128xf32>
    %14 = arith.negf %13 : vector<8x128xf32>
    %15 = math.exp %14 : vector<8x128xf32>
    %cst_12 = arith.constant 1.000000e+00 : f32
    %16 = vector.broadcast %cst_12 : f32 to vector<8x128xf32>
    %17 = arith.addf %16, %15 : vector<8x128xf32>
    %18 = arith.divf %16, %17 : vector<8x128xf32>
    %19 = vector.extract_strided_slice %12 {offsets = [0, 128], sizes = [8, 128], strides = [1, 1]} : vector<8x640xf32> to vector<8x128xf32>
    %20 = arith.negf %19 : vector<8x128xf32>
    %21 = math.exp %20 : vector<8x128xf32>
    %cst_13 = arith.constant 1.000000e+00 : f32
    %22 = vector.broadcast %cst_13 : f32 to vector<8x128xf32>
    %23 = arith.addf %22, %21 : vector<8x128xf32>
    %24 = arith.divf %22, %23 : vector<8x128xf32>
    %25 = vector.extract_strided_slice %12 {offsets = [0, 256], sizes = [8, 128], strides = [1, 1]} : vector<8x640xf32> to vector<8x128xf32>
    %26 = vector.extract_strided_slice %12 {offsets = [0, 384], sizes = [8, 128], strides = [1, 1]} : vector<8x640xf32> to vector<8x128xf32>
    %27 = arith.mulf %18, %26 : vector<8x128xf32>
    %28 = arith.addf %25, %27 : vector<8x128xf32>
    %29 = math.tanh %28 : vector<8x128xf32>
    %30 = vector.extract_strided_slice %12 {offsets = [0, 512], sizes = [8, 128], strides = [1, 1]} : vector<8x640xf32> to vector<8x128xf32>
    %c0_14 = arith.constant 0 : index
    %c0_15 = arith.constant 0 : index
    %c0_16 = arith.constant 0 : index
    %31 = vector.load %arg6[%c0_14, %c0_15, %c0_16] : memref<1x8x128xf32, #tpu.memory_space<vmem>>, vector<1x8x128xf32>
    %32 = vector.shape_cast %31 : vector<1x8x128xf32> to vector<8x128xf32>
    %33 = vector.shape_cast %30 : vector<8x128xf32> to vector<1x8x128xf32>
    tpu.vector_store %arg6[%c0_14, %c0_15, %c0_16], %33 {strides = array<i32>} : memref<1x8x128xf32, #tpu.memory_space<vmem>>, vector<1x8x128xf32>,
    %cst_17 = arith.constant 1.000000e+00 : f32
    %34 = vector.broadcast %cst_17 : f32 to vector<8x128xf32>
    %35 = arith.subf %34, %24 : vector<8x128xf32>
    %36 = arith.mulf %35, %29 : vector<8x128xf32>
    %37 = arith.mulf %24, %5 : vector<8x128xf32>
    %38 = arith.addf %36, %37 : vector<8x128xf32>
    %c0_18 = arith.constant 0 : index
    %c0_19 = arith.constant 0 : index
    %39 = vector.load %arg7[%c0_18, %c0_19] : memref<8x128xf32, #tpu.memory_space<vmem>>, vector<8x128xf32>
    tpu.vector_store %arg7[%c0_18, %c0_19], %38 {strides = array<i32>} : memref<8x128xf32, #tpu.memory_space<vmem>>, vector<8x128xf32>,
    return
  }
  func.func @transform_0(%arg0: i32) -> (i32, i32, i32) {
    %c0_i32 = arith.constant 0 : i32
    %c0_i32_0 = arith.constant 0 : i32
    %c0_i32_1 = arith.constant 0 : i32
    return %arg0, %c0_i32, %c0_i32_0 : i32, i32, i32
  }
  func.func @transform_1(%arg0: i32) -> (i32, i32) {
    %c0_i32 = arith.constant 0 : i32
    %c0_i32_0 = arith.constant 0 : i32
    %c0_i32_1 = arith.constant 0 : i32
    return %c0_i32, %c0_i32_0 : i32, i32
  }
  func.func @transform_2(%arg0: i32) -> (i32, i32) {
    %c0_i32 = arith.constant 0 : i32
    %c0_i32_0 = arith.constant 0 : i32
    %c0_i32_1 = arith.constant 0 : i32
    return %c0_i32, %c0_i32_0 : i32, i32
  }
  func.func @transform_3(%arg0: i32) -> (i32, i32) {
    %c0_i32 = arith.constant 0 : i32
    %c0_i32_0 = arith.constant 0 : i32
    %c0_i32_1 = arith.constant 0 : i32
    return %c0_i32, %c0_i32_0 : i32, i32
  }
  func.func @transform_4(%arg0: i32) -> (i32, i32) {
    %c0_i32 = arith.constant 0 : i32
    %c0_i32_0 = arith.constant 0 : i32
    %c0_i32_1 = arith.constant 0 : i32
    return %c0_i32, %c0_i32_0 : i32, i32
  }
  func.func @transform_5(%arg0: i32) -> (i32, i32, i32) {
    %c0_i32 = arith.constant 0 : i32
    %c0_i32_0 = arith.constant 0 : i32
    %c0_i32_1 = arith.constant 0 : i32
    return %arg0, %c0_i32, %c0_i32_0 : i32, i32, i32
  }
  func.func @transform_6(%arg0: i32) -> (i32, i32) {
    %c0_i32 = arith.constant 0 : i32
    %c0_i32_0 = arith.constant 0 : i32
    %c0_i32_1 = arith.constant 0 : i32
    return %c0_i32, %c0_i32_0 : i32, i32
  }
}

</mosaic_0001>

<bundles_post_ra>
// kernel: tpu_custom_call.1
= control target key start
LH: loop header
LB: loop body
LE: loop exit
PB: predicated region body
PF: predicated region fallthrough
CT: control target
= control target key end

     0   :  { %s1891_s0 = inlined_call_operand.hbm [shape: f32[8,8,128], index: 0, kind: input, shape index: {}]   ;;  %s1892_s1 = inlined_call_operand.hbm [shape: f32[8,128], index: 1, kind: input, shape index: {}]   ;;  %s1893_s2 = inlined_call_operand.hbm [shape: f32[128,640], index: 2, kind: input, shape index: {}]   ;;  %s1894_s3 = inlined_call_operand.hbm [shape: f32[128,640], index: 3, kind: input, shape index: {}]   ;;  %s1895_s4 = inlined_call_operand.hbm [shape: f32[8,640], index: 4, kind: input, shape index: {}]   ;;  %s1896_s5 = inlined_call_operand.hbm [shape: f32[8,8,128], index: 5, kind: output, shape index: {0}]   ;;  %s1897_s6 = inlined_call_operand.hbm [shape: f32[8,128], index: 6, kind: output, shape index: {1}]  }
   0x1   :  { %1903 = sst [smem:[#allocation19_spill]] %s1892_s1 }
   0x2   :  { %12 = vsyncpa [#allocation3], 0 }
   0x3   :  { %14 = vsyncpa [#allocation3 + $0x1], 0 }
   0x4   :  { %15 = vsyncpa [#allocation6], 0 }
   0x5   :  { %16 = vsyncpa [#allocation9], 0 }
   0x6   :  { %17 = vsyncpa [#allocation4], 0 }
   0x7   :  { %19 = vsyncpa [#allocation4 + $0x1], 0 }
   0x8   :  { %20 = vsyncpa [#allocation13], 0  ;;  %s1604_s21 = smov 0   ;;  %s1606_s22 = smov 0  }
   0x9   :  { %s1608_s23 = smov 0   ;;  %s1610_s24 = smov 0  }
   0xa LB: > { %s1558_s25 = smov [#allocation5]   ;;  %s1625_s27 = sadd.s32 4294967295, %s1556_s24   ;;  %s1556_s24 = sphi %s1610_s24, %s1928_s24   ;;  %s1552_s23 = sphi %s1608_s23, %s1927_s23   ;;  %s1548_s22 = sphi %s1606_s22, %s1926_s22   ;;  %s1544_s21 = sphi %s1604_s21, %s1925_s21  }
   0xb   : > { %s201_s26 = sshll.u32 %s1558_s25, 4  ;;  %p1088_p0 = scmp.ge.s32.totalorder %s1556_s24, 1  ;;  %s202_s26 = int_to_ptr.vmem [resolvable:$true] %s201_s26 }
   0xc   : > { %p1899_p1 = scmp.eq.s32.totalorder %s1625_s27, 0  ;;  %p188_p2 = scmp.lt.s32.totalorder %s1556_s24, 9 }
   0xd   : > { %s1559_s29 = smov [#allocation8]   ;;  %s1560_s8 = smov [#allocation7]  }
   0xe   : > { %p1631_p4 = pnand %p1088_p0, %p188_p2  ;;  %s224_s30 = sshll.u32 %s1559_s29, 4  ;;  %s1643_s30 = int_to_ptr.vmem [resolvable:$true] %s224_s30 }
   0xf   : > { %s211_s9 = sshll.u32 %s1560_s8, 4  ;;  %s1335_s10 = scalar_lea.vmem %s202_s26, 128  ;;  %s1645_s9 = int_to_ptr.vmem [resolvable:$true] %s211_s9 }
  0x10   : > { %s1904_s28 = scalar_select %p1631_p4, 1, 0 }
  0x11   : > { %p1240_p5 = pneg %p1631_p4  ;;  %p1336_p8 = scmp.ne.s32.totalorder %s202_s26, %s1335_s10 }
  0x12   : > { %p1343_p11 = scmp.lt.s32.totalorder %s202_s26, %s202_s26  ;;  %p1344_p12 = scmp.lt.s32.totalorder %s1335_s10, %s1335_s10 }
  0x13   : > { %p1639_p6 = pnand %p1240_p5, %p1899_p1 }
  0x14   : > { %p1345_p13 = por %p1344_p12, %p1343_p11 }
  0x15   : > { %p1326_p7 = pneg %p1639_p6 }
  0x17   : > { %p1338_p9 = pnand %p1336_p8, %p1326_p7 }
  0x19   : > { %p1339_p10 = pneg %p1338_p9 }
  0x1b   : > { %p1346_p0 = pnand %p1345_p13, %p1339_p10 }
  0x1d   : > { %1349 = shalt.err (!%p1346_p0)
}
  0x1e   : > { %s1906_s1 = sld [smem:[#allocation19_spill]]  ;;  %s1361_s13 = scalar_lea.vmem %s1643_s30, 10240 }
  0x1f   : > { %p1362_p2 = scmp.ne.s32.totalorder %s1643_s30, %s1361_s13  ;;  %p1369_p9 = scmp.lt.s32.totalorder %s1643_s30, %s1643_s30 }
  0x20   : > { %p1370_p10 = scmp.lt.s32.totalorder %s1361_s13, %s1361_s13 }
  0x21   : > { %p1364_p5 = pnand %p1362_p2, %p1326_p7 }
  0x22   : > { %p1371_p11 = por %p1370_p10, %p1369_p9 }
  0x23   : > { %p1365_p8 = pneg %p1364_p5 }
  0x24   : > { %1243 = dma.hbm_to_vmem [thread:$0]  (!%p1639_p6), %s1906_s1, 128, %s202_s26, [#allocation6]  }
  0x25   : > { %p1372_p12 = pnand %p1371_p11, %p1365_p8 }
  0x27   : > { %1375 = shalt.err (!%p1372_p12)
}
  0x28   : > { %s1561_s14 = smov 640   ;;  %s1562_s15 = smov 40  }
  0x29   : > { %1249 = dma.hbm_to_vmem [thread:$0]  (!%p1639_p6), %s1894_s3, 10240, %s1643_s30, [#allocation9], %s1561_s14, %s1561_s14, %s1562_s15  }
  0x2a   : > { %s1387_s18 = scalar_lea.vmem %s1645_s9, 10240  ;;  %p1395_p5 = scmp.lt.s32.totalorder %s1645_s9, %s1645_s9 }
  0x2b   : > { %p1388_p13 = scmp.ne.s32.totalorder %s1645_s9, %s1387_s18  ;;  %p1396_p8 = scmp.lt.s32.totalorder %s1387_s18, %s1387_s18 }
  0x2d   : > { %p1390_p0 = pnand %p1388_p13, %p1326_p7  ;;  %p1397_p9 = por %p1396_p8, %p1395_p5 }
  0x2f   : > { %p1391_p2 = pneg %p1390_p0 }
  0x31   : > { %p1398_p10 = pnand %p1397_p9, %p1391_p2 }
  0x33   : > { %1401 = shalt.err (!%p1398_p10)
}
  0x34   : > { %1246 = dma.hbm_to_vmem [thread:$0]  (!%p1639_p6), %s1893_s2, 10240, %s1645_s9, [#allocation6], %s1561_s14, %s1561_s14, %s1562_s15  }
  0x35   : > { %s1563_s25 = smov [#allocation10]  }
  0x36   : > { %s238_s26 = sshll.u32 %s1563_s25, 4  ;;  %s239_s26 = int_to_ptr.vmem [resolvable:$true] %s238_s26 }
  0x37   : > { %s1413_s29 = scalar_lea.vmem %s239_s26, 640  ;;  %p1421_p0 = scmp.lt.s32.totalorder %s239_s26, %s239_s26 }
  0x38   : > { %p1414_p11 = scmp.ne.s32.totalorder %s239_s26, %s1413_s29  ;;  %p1422_p2 = scmp.lt.s32.totalorder %s1413_s29, %s1413_s29 }
  0x3a   : > { %p1416_p12 = pnand %p1414_p11, %p1326_p7  ;;  %p1423_p5 = por %p1422_p2, %p1421_p0 }
  0x3c   : > { %p1417_p13 = pneg %p1416_p12 }
  0x3e   : > { %p1424_p8 = pnand %p1423_p5, %p1417_p13 }
  0x40   : > { %1427 = shalt.err (!%p1424_p8)
}
  0x41   : > { %1252 = dma.hbm_to_vmem [thread:$0]  (!%p1639_p6), %s1895_s4, 640, %s239_s26, [#allocation9]  }
  0x42   : > { %s1087_s7 = sadd.s32 4294967294, %s1556_s24   ;;  %s1693_s9 = sadd.s32 1, %s1556_s24  }
  0x43   : > { %s30_s10 = ssub.s32 %s1556_s24, %s1693_s9  ;;  %s33_s11 = sadd.s32 1, %s1552_s23 }
  0x44   : > { %p31_p7 = scmp.eq.s32.totalorder %s30_s10, 0  ;;  %p40_p9 = scmp.ne.s32.totalorder %s1552_s23, %s1548_s22 }
  0x45   : > { %p41_p10 = scmp.eq.s32.totalorder %s1556_s24, 0  ;;  %p46_p11 = scmp.ne.s32.totalorder %s1548_s22, %s1544_s21 }
  0x46   : > { %s1704_s12 = scalar_select %p31_p7, %s1552_s23, %s33_s11  }
  0x47   : > { %p1706_p12 = por %p41_p10, %p40_p9  ;;  %p1712_p6 = por %p1899_p1, %p46_p11 }
  0x48   : > { %p1898_p13 = scmp.eq.s32.totalorder %s1625_s27, 7  ;;  %p160_p0 = scmp.eq.s32.totalorder %s1087_s7, 7 }
  0x49   : > { %s1908_s14 = scalar_select %p1712_p6, 1, 0 }
  0x4a   : > { %p1265_p2 = scmp.lt.s32.totalorder %s1556_s24, 8  ;;  %s249_s15 = sand.u32 1, %s1552_s23  }
  0x4b   : > { %p1721_p5 = por %p1898_p13, %p40_p9  ;;  %p1725_p8 = por %p160_p0, %p46_p11 }
  0x4c   : > { %s1094_s18 = sshll.u32 %s249_s15, 3  ;;  %s1095_s19 = sshll.u32 %s1556_s24, 7 }
  0x4d   : > { %s1909_s16 = scalar_select %p1721_p5, 1, 0 }
  0x4e   : > { %s1910_s17 = scalar_select %p1725_p8, 1, 0 }
  0x4f   : > { %s1733_s26 = scalar_lea.hbm %s1891_s0, %s1095_s19  ;;  %s253_s29 = scalar_lea.vmem [#allocation2], %s1094_s18 }
  0x50   : > { %s260_s30 = sshll.u32 %s253_s29, 4  ;;  %p1737_p7 = pnand %p1265_p2, %p1706_p12  ;;  %s261_s30 = int_to_ptr.vmem [resolvable:$true] %s260_s30 }
  0x51   : > { %s250_s7 = scalar_lea.sflag [#allocation3], %s249_s15  ;;  %s1428_s10 = scalar_lea.hbm %s1733_s26, 128 }
  0x52   : > { %p1429_p9 = scmp.ne.s32.totalorder %s1733_s26, %s1428_s10  ;;  %p1430_p10 = pneg %p1737_p7 }
  0x53   : > { %s1433_s20 = scalar_lea.hbm %s1891_s0, 1024  ;;  %p1434_p13 = scmp.lt.s32.totalorder %s1733_s26, %s1891_s0 }
  0x54   : > { %p1431_p11 = pnand %p1430_p10, %p1429_p9  ;;  %p1435_p12 = scmp.lt.s32.totalorder %s1433_s20, %s1428_s10 }
  0x56   : > { %p1432_p0 = pneg %p1431_p11  ;;  %p1436_p2 = por %p1435_p12, %p1434_p13 }
  0x58   : > { %p1437_p3 = pnand %p1436_p2, %p1432_p0 }
  0x5a   : > { %1440 = shalt.err (!%p1437_p3)
}
  0x5b   : > { %s1441_s13 = scalar_lea.vmem %s261_s30, 128  ;;  %s1564_s15 = smov [#allocation2]  }
  0x5c   : > { %p1442_p1 = scmp.ne.s32.totalorder %s261_s30, %s1441_s13  ;;  %s1446_s29 = sshll.u32 %s1564_s15, 4  ;;  %s1447_s29 = int_to_ptr.vmem [resolvable:$false] %s1446_s29 }
  0x5d   : > { %s1448_s1 = scalar_lea.vmem %s1447_s29, 256  ;;  %p1449_p9 = scmp.lt.s32.totalorder %s261_s30, %s1447_s29 }
  0x5e   : > { %p1444_p8 = pnand %p1442_p1, %p1430_p10  ;;  %p1450_p11 = scmp.lt.s32.totalorder %s1448_s1, %s1441_s13 }
  0x60   : > { %p1445_p5 = pneg %p1444_p8  ;;  %p1451_p6 = por %p1450_p11, %p1449_p9 }
  0x62   : > { %p1452_p4 = pnand %p1451_p6, %p1445_p5 }
  0x64   : > { %1455 = shalt.err (!%p1452_p4)
}
  0x65   : > { %1256 = dma.hbm_to_vmem [thread:$0]  (!%p1737_p7), %s1733_s26, 128, %s261_s30, %s250_s7  }
  0x66   : > { %p1912_p13 = scmp.ne.s32.totalorder %s1904_s28, 0 }
  0x67   : > { %s1758_s10 = sand.u32 (!%p1912_p13), 1, %s1548_s22   ;;  %p1913_p1 = scmp.ne.s32.totalorder (!%p1912_p13), %s1908_s14, 0 }
  0x68   : > { %269 = sbr.rel (%p1912_p13) target bundleno = 467 (0x1d3), region = 40  ;;  %s1097_s11 = sshll.u32 (!%p1912_p13), %s1758_s10, 3 }
  0x69   : > { %s272_s19 = scalar_lea.sflag (!%p1912_p13), [#allocation3], %s1758_s10  ;;  %s1762_s20 = scalar_lea.vmem (!%p1912_p13), [#allocation2], %s1097_s11 }
  0x6d   : > { %1523 = dma.done.wait (%p1913_p1), %s272_s19, 128  }
  0x6e   : > { %1525 = vsyncadd (%p1913_p1), %s272_s19, 4294967168  ;;  %p1914_p3 = scmp.eq.s32.totalorder %s1625_s27, 0 }
  0x70   : > { %1527 = dma.done.wait (%p1914_p3), [#allocation6], 10368   ;;  %p1915_p4 = pmov %p1914_p3 }
  0x71   : > { %p1916_p6 = pmov %p1914_p3 }
  0x72   : > { %1529 = vsyncadd (%p1915_p4), [#allocation6], 4294956928 }
  0x73   : > { %1531 = dma.done.wait (%p1916_p6), [#allocation9], 10880   ;;  %p1917_p5 = pmov %p1914_p3 }
  0x74   : > { %s1776_s1 = scalar_lea.vmem [#allocation11], %s1097_s11  ;;  %p1918_p8 = scmp.ne.s32.totalorder %s1625_s27, 0 }
  0x75   : > { %1533 = vsyncadd (%p1917_p5), [#allocation9], 4294956416 }
  0x76   : > { %323 = sbr.rel (%p1918_p8) target bundleno = 125 (0x7d), region = 64 }
  0x7b   : > { %v324_v0 = vld [vmem:[#allocation5] sm:$0xff] }
  0x7c   : > { %325 = vst [vmem:[#allocation12] sm:$0xff] %v324_v0 }
  0x7d PF: > { %v484_v1 = vld [vmem:[#allocation8 + $0x260] sm:$0xff]  ;;  %v486_v2 = vld [vmem:[#allocation8 + $0x270] sm:$0xff]  ;;  %v483_v3 = vld [vmem:[#allocation8 + $0x258] sm:$0xff]  ;;  %vm1566_vm0 = vmmov 0   ;;  %s1107_s28 = sshll.u32 %s1625_s27, 7  ;;  %s957_s14 = sshll.u32 %s1776_s1, 4  ;;  %s1838_s14 = int_to_ptr.vmem [resolvable:$true] %s957_s14 }
  0x7e   : > { %488 = vmatprep.subr.mxu0 %v484_v1  ;;  %559 = vmatprep.subr.mxu1 %v486_v2  ;;  %v485_v4 = vld [vmem:[#allocation8 + $0x268] sm:$0xff]  ;;  %v479_v5 = vld [vmem:[#allocation8 + $0x238] sm:$0xff]  ;;  %v478_v7 = vld [vmem:[#allocation8 + $0x230] sm:$0xff]  ;;  %v1565_v2 = vmov 0.0   ;;  %s1836_s8 = scalar_lea.hbm %s1896_s5, %s1107_s28  ;;  %s944_s7 = scalar_lea.sflag [#allocation4], %s1758_s10 }
  0x7f   : > { %v481_v6 = vld [vmem:[#allocation8 + $0x248] sm:$0xff]  ;;  %489 = vmatpush1.msra.mxu0 %v483_v3  ;;  %560 = vmatpush1.msra.mxu1 %v485_v4  ;;  %v480_v8 = vld [vmem:[#allocation8 + $0x240] sm:$0xff]  ;;  %v474_v9 = vld [vmem:[#allocation8 + $0x210] sm:$0xff]  ;;  %s1456_s18 = scalar_lea.vmem %s1838_s14, 128  ;;  %p1919_p10 = scmp.ne.s32.totalorder %s1909_s16, 0 }
  0x80   : > { %490 = vmatprep.subr.mxu0 %v479_v5  ;;  %561 = vmatprep.subr.mxu1 %v481_v6  ;;  %v476_v10 = vld [vmem:[#allocation8 + $0x220] sm:$0xff]  ;;  %v473_v11 = vld [vmem:[#allocation8 + $0x208] sm:$0xff]  ;;  %v475_v12 = vld [vmem:[#allocation8 + $0x218] sm:$0xff]  ;;  %p1457_p7 = scmp.ne.s32.totalorder %s1838_s14, %s1456_s18  ;;  %s1567_s25 = smov [#allocation11]  }
  0x81   : > { %491 = vmatpush1.msra.mxu0 %v478_v7  ;;  %562 = vmatpush1.msra.mxu1 %v480_v8  ;;  %v469_v13 = vld [vmem:[#allocation8 + $0x1e8] sm:$0xff]  ;;  %v471_v14 = vld [vmem:[#allocation8 + $0x1f8] sm:$0xff]  ;;  %v468_v15 = vld [vmem:[#allocation8 + $0x1e0] sm:$0xff]  ;;  %s1460_s13 = sshll.u32 %s1567_s25, 4  ;;  %s1461_s13 = int_to_ptr.vmem [resolvable:$false] %s1460_s13 }
  0x82   : > { %492 = vmatprep.subr.mxu0 %v474_v9  ;;  %563 = vmatprep.subr.mxu1 %v476_v10  ;;  %v470_v16 = vld [vmem:[#allocation8 + $0x1f0] sm:$0xff]  ;;  %v464_v17 = vld [vmem:[#allocation8 + $0x1c0] sm:$0xff]  ;;  %v463_v19 = vld [vmem:[#allocation8 + $0x1b8] sm:$0xff]  ;;  %p1458_p0 = pnand %p1457_p7, %p1919_p10  ;;  %s1462_s15 = scalar_lea.vmem %s1461_s13, 256 }
  0x83   : > { %493 = vmatpush1.msra.mxu0 %v473_v11  ;;  %564 = vmatpush1.msra.mxu1 %v475_v12  ;;  %v466_v18 = vld [vmem:[#allocation8 + $0x1d0] sm:$0xff]  ;;  %v465_v20 = vld [vmem:[#allocation8 + $0x1c8] sm:$0xff]  ;;  %v459_v21 = vld [vmem:[#allocation8 + $0x198] sm:$0xff]  ;;  %p1463_p2 = scmp.lt.s32.totalorder %s1838_s14, %s1461_s13  ;;  %p1464_p9 = scmp.lt.s32.totalorder %s1462_s15, %s1456_s18 }
  0x84   : > { %494 = vmatprep.subr.mxu0 %v469_v13  ;;  %565 = vmatprep.subr.mxu1 %v471_v14  ;;  %v461_v22 = vld [vmem:[#allocation8 + $0x1a8] sm:$0xff]  ;;  %v458_v23 = vld [vmem:[#allocation8 + $0x190] sm:$0xff]  ;;  %v460_v24 = vld [vmem:[#allocation8 + $0x1a0] sm:$0xff]  ;;  %p1459_p12 = pneg %p1458_p0 }
  0x85   : > { %495 = vmatpush1.msra.mxu0 %v468_v15  ;;  %566 = vmatpush1.msra.mxu1 %v470_v16  ;;  %v454_v25 = vld [vmem:[#allocation8 + $0x170] sm:$0xff]  ;;  %v456_v26 = vld [vmem:[#allocation8 + $0x180] sm:$0xff]  ;;  %v453_v27 = vld [vmem:[#allocation8 + $0x168] sm:$0xff]  ;;  %p1465_p11 = por %p1464_p9, %p1463_p2 }
  0x86   : > { %496 = vmatprep.subr.mxu0 %v464_v17  ;;  %567 = vmatprep.subr.mxu1 %v466_v18  ;;  %v455_v28 = vld [vmem:[#allocation8 + $0x178] sm:$0xff]  ;;  %v449_v29 = vld [vmem:[#allocation8 + $0x148] sm:$0xff]  ;;  %v448_v31 = vld [vmem:[#allocation8 + $0x140] sm:$0xff] }
  0x87   : > { %497 = vmatpush1.msra.mxu0 %v463_v19  ;;  %568 = vmatpush1.msra.mxu1 %v465_v20  ;;  %v451_v30 = vld [vmem:[#allocation8 + $0x158] sm:$0xff]  ;;  %v450_v32 = vld [vmem:[#allocation8 + $0x150] sm:$0xff]  ;;  %v444_v33 = vld [vmem:[#allocation8 + $0x120] sm:$0xff]  ;;  %p1466_p13 = pnand %p1465_p11, %p1459_p12 }
  0x88   : > { %498 = vmatprep.subr.mxu0 %v459_v21  ;;  %569 = vmatprep.subr.mxu1 %v461_v22  ;;  %v446_v34 = vld [vmem:[#allocation8 + $0x130] sm:$0xff]  ;;  %v443_v35 = vld [vmem:[#allocation8 + $0x118] sm:$0xff]  ;;  %v445_v36 = vld [vmem:[#allocation8 + $0x128] sm:$0xff] }
  0x89   : > { %499 = vmatpush1.msra.mxu0 %v458_v23  ;;  %570 = vmatpush1.msra.mxu1 %v460_v24  ;;  %v439_v37 = vld [vmem:[#allocation8 + $0xf8] sm:$0xff]  ;;  %v441_v38 = vld [vmem:[#allocation8 + $0x108] sm:$0xff]  ;;  %v438_v39 = vld [vmem:[#allocation8 + $0xf0] sm:$0xff] }
  0x8a   : > { %500 = vmatprep.subr.mxu0 %v454_v25  ;;  %571 = vmatprep.subr.mxu1 %v456_v26  ;;  %v440_v40 = vld [vmem:[#allocation8 + $0x100] sm:$0xff]  ;;  %v434_v41 = vld [vmem:[#allocation8 + $0xd0] sm:$0xff]  ;;  %v433_v43 = vld [vmem:[#allocation8 + $0xc8] sm:$0xff] }
  0x8b   : > { %501 = vmatpush1.msra.mxu0 %v453_v27  ;;  %572 = vmatpush1.msra.mxu1 %v455_v28  ;;  %v436_v42 = vld [vmem:[#allocation8 + $0xe0] sm:$0xff]  ;;  %v435_v44 = vld [vmem:[#allocation8 + $0xd8] sm:$0xff]  ;;  %v429_v45 = vld [vmem:[#allocation8 + $0xa8] sm:$0xff] }
  0x8c   : > { %502 = vmatprep.subr.mxu0 %v449_v29  ;;  %573 = vmatprep.subr.mxu1 %v451_v30  ;;  %v431_v46 = vld [vmem:[#allocation8 + $0xb8] sm:$0xff]  ;;  %v428_v47 = vld [vmem:[#allocation8 + $0xa0] sm:$0xff]  ;;  %v430_v48 = vld [vmem:[#allocation8 + $0xb0] sm:$0xff] }
  0x8d   : > { %503 = vmatpush1.msra.mxu0 %v448_v31  ;;  %574 = vmatpush1.msra.mxu1 %v450_v32  ;;  %v424_v49 = vld [vmem:[#allocation8 + $0x80] sm:$0xff]  ;;  %v426_v50 = vld [vmem:[#allocation8 + $0x90] sm:$0xff]  ;;  %v423_v51 = vld [vmem:[#allocation8 + $0x78] sm:$0xff] }
  0x8e   : > { %504 = vmatprep.subr.mxu0 %v444_v33  ;;  %575 = vmatprep.subr.mxu1 %v446_v34  ;;  %v425_v52 = vld [vmem:[#allocation8 + $0x88] sm:$0xff]  ;;  %v419_v53 = vld [vmem:[#allocation8 + $0x58] sm:$0xff]  ;;  %v418_v55 = vld [vmem:[#allocation8 + $0x50] sm:$0xff] }
  0x8f   : > { %505 = vmatpush1.msra.mxu0 %v443_v35  ;;  %576 = vmatpush1.msra.mxu1 %v445_v36  ;;  %v421_v54 = vld [vmem:[#allocation8 + $0x68] sm:$0xff]  ;;  %v420_v56 = vld [vmem:[#allocation8 + $0x60] sm:$0xff]  ;;  %v414_v57 = vld [vmem:[#allocation8 + $0x30] sm:$0xff] }
  0x90   : > { %506 = vmatprep.subr.mxu0 %v439_v37  ;;  %577 = vmatprep.subr.mxu1 %v441_v38  ;;  %v416_v58 = vld [vmem:[#allocation8 + $0x40] sm:$0xff]  ;;  %v413_v59 = vld [vmem:[#allocation8 + $0x28] sm:$0xff]  ;;  %v415_v60 = vld [vmem:[#allocation8 + $0x38] sm:$0xff] }
  0x91   : > { %507 = vmatpush1.msra.mxu0 %v438_v39  ;;  %578 = vmatpush1.msra.mxu1 %v440_v40  ;;  %v409_v61 = vld [vmem:[#allocation8 + $0x8] sm:$0xff]  ;;  %v411_v62 = vld [vmem:[#allocation8 + $0x18] sm:$0xff]  ;;  %v408_v63 = vld [vmem:[#allocation8] sm:$0xff] }
  0x92   : > { %508 = vmatprep.subr.mxu0 %v434_v41  ;;  %579 = vmatprep.subr.mxu1 %v436_v42  ;;  %v410_v0 = vld [vmem:[#allocation8 + $0x10] sm:$0xff]  ;;  %v1780_v1 = vld [vmem:[#allocation12] sm:$0xff]  ;;  %v404_v3 = vld [vmem:[#allocation7 + $0x260] sm:$0xff] }
  0x93   : > { %509 = vmatpush1.msra.mxu0 %v433_v43  ;;  %580 = vmatpush1.msra.mxu1 %v435_v44  ;;  %v487_v4 = vld [vmem:[#allocation8 + $0x278] sm:$0xff]  ;;  %v482_v7 = vld [vmem:[#allocation8 + $0x250] sm:$0xff]  ;;  %v477_v10 = vld [vmem:[#allocation8 + $0x228] sm:$0xff] }
  0x94   : > { %510 = vmatprep.subr.mxu0 %v429_v45  ;;  %581 = vmatprep.subr.mxu1 %v431_v46  ;;  %v403_v5 = vld [vmem:[#allocation7 + $0x258] sm:$0xff]  ;;  %v398_v8 = vld [vmem:[#allocation7 + $0x230] sm:$0xff]  ;;  %v393_v11 = vld [vmem:[#allocation7 + $0x208] sm:$0xff] }
  0x95   : > { %511 = vmatpush1.msra.mxu0 %v428_v47  ;;  %582 = vmatpush1.msra.mxu1 %v430_v48  ;;  %v399_v6 = vld [vmem:[#allocation7 + $0x238] sm:$0xff]  ;;  %v394_v9 = vld [vmem:[#allocation7 + $0x210] sm:$0xff]  ;;  %v389_v12 = vld [vmem:[#allocation7 + $0x1e8] sm:$0xff] }
  0x96   : > { %512 = vmatprep.subr.mxu0 %v424_v49  ;;  %583 = vmatprep.subr.mxu1 %v426_v50  ;;  %v472_v13 = vld [vmem:[#allocation8 + $0x200] sm:$0xff]  ;;  %v467_v16 = vld [vmem:[#allocation8 + $0x1d8] sm:$0xff]  ;;  %v462_v19 = vld [vmem:[#allocation8 + $0x1b0] sm:$0xff] }
  0x97   : > { %513 = vmatpush1.msra.mxu0 %v423_v51  ;;  %584 = vmatpush1.msra.mxu1 %v425_v52  ;;  %v388_v14 = vld [vmem:[#allocation7 + $0x1e0] sm:$0xff]  ;;  %v383_v17 = vld [vmem:[#allocation7 + $0x1b8] sm:$0xff]  ;;  %v378_v20 = vld [vmem:[#allocation7 + $0x190] sm:$0xff] }
  0x98   : > { %514 = vmatprep.subr.mxu0 %v419_v53  ;;  %585 = vmatprep.subr.mxu1 %v421_v54  ;;  %v384_v15 = vld [vmem:[#allocation7 + $0x1c0] sm:$0xff]  ;;  %v379_v18 = vld [vmem:[#allocation7 + $0x198] sm:$0xff]  ;;  %v374_v21 = vld [vmem:[#allocation7 + $0x170] sm:$0xff] }
  0x99   : > { %515 = vmatpush1.msra.mxu0 %v418_v55  ;;  %586 = vmatpush1.msra.mxu1 %v420_v56  ;;  %v457_v22 = vld [vmem:[#allocation8 + $0x188] sm:$0xff]  ;;  %v452_v25 = vld [vmem:[#allocation8 + $0x160] sm:$0xff]  ;;  %v447_v28 = vld [vmem:[#allocation8 + $0x138] sm:$0xff] }
  0x9a   : > { %516 = vmatprep.subr.mxu0 %v414_v57  ;;  %587 = vmatprep.subr.mxu1 %v416_v58  ;;  %v373_v23 = vld [vmem:[#allocation7 + $0x168] sm:$0xff]  ;;  %v368_v26 = vld [vmem:[#allocation7 + $0x140] sm:$0xff]  ;;  %v363_v29 = vld [vmem:[#allocation7 + $0x118] sm:$0xff] }
  0x9b   : > { %517 = vmatpush1.msra.mxu0 %v413_v59  ;;  %588 = vmatpush1.msra.mxu1 %v415_v60  ;;  %v369_v24 = vld [vmem:[#allocation7 + $0x148] sm:$0xff]  ;;  %v364_v27 = vld [vmem:[#allocation7 + $0x120] sm:$0xff]  ;;  %v359_v30 = vld [vmem:[#allocation7 + $0xf8] sm:$0xff] }
  0x9c   : > { %518 = vmatprep.subr.mxu0 %v409_v61  ;;  %589 = vmatprep.subr.mxu1 %v411_v62  ;;  %v442_v31 = vld [vmem:[#allocation8 + $0x110] sm:$0xff]  ;;  %v437_v34 = vld [vmem:[#allocation8 + $0xe8] sm:$0xff]  ;;  %v432_v37 = vld [vmem:[#allocation8 + $0xc0] sm:$0xff] }
  0x9d   : > { %519 = vmatpush1.msra.mxu0 %v408_v63  ;;  %552 = vmatprep.mubr.f32.mxu0 %v1565_v2  ;;  %v358_v32 = vld [vmem:[#allocation7 + $0xf0] sm:$0xff]  ;;  %v353_v35 = vld [vmem:[#allocation7 + $0xc8] sm:$0xff]  ;;  %v348_v38 = vld [vmem:[#allocation7 + $0xa0] sm:$0xff] }
  0x9e   : > { %590 = vmatpush1.msra.mxu1 %v410_v0  ;;  %553 = vmatmul.mubr.f32.vlgmr.msra.gmra.mxu0 %v1780_v1  ;;  %v354_v33 = vld [vmem:[#allocation7 + $0xd0] sm:$0xff]  ;;  %v349_v36 = vld [vmem:[#allocation7 + $0xa8] sm:$0xff]  ;;  %v344_v39 = vld [vmem:[#allocation7 + $0x80] sm:$0xff] }
  0x9f   : > { %623 = vmatprep.mubr.f32.mxu1 %v1565_v2  ;;  %1146 = vmatprep.subr.mxu0 %v1565_v2  ;;  %v427_v40 = vld [vmem:[#allocation8 + $0x98] sm:$0xff]  ;;  %v422_v43 = vld [vmem:[#allocation8 + $0x70] sm:$0xff]  ;;  %v417_v46 = vld [vmem:[#allocation8 + $0x48] sm:$0xff] }
  0xa0   : > { %700 = vmatprep.subr.mxu1 %v404_v3  ;;  %624 = vmatmul.mubr.f32.vlgmr.msra.gmra.mxu1 %v1780_v1  ;;  %v343_v41 = vld [vmem:[#allocation7 + $0x78] sm:$0xff]  ;;  %v338_v44 = vld [vmem:[#allocation7 + $0x50] sm:$0xff]  ;;  %v333_v47 = vld [vmem:[#allocation7 + $0x28] sm:$0xff] }
  0xa1   : > { %1147 = vmatpush3.msra.mxu0 %v487_v4  ;;  %701 = vmatpush1.msra.mxu1 %v403_v5  ;;  %v339_v42 = vld [vmem:[#allocation7 + $0x58] sm:$0xff]  ;;  %v334_v45 = vld [vmem:[#allocation7 + $0x30] sm:$0xff]  ;;  %v329_v48 = vld [vmem:[#allocation7 + $0x8] sm:$0xff] }
  0xa2   : > { %1148 = vmatprep.subr.mxu0 %v1565_v2  ;;  %702 = vmatprep.subr.mxu1 %v399_v6  ;;  %v412_v49 = vld [vmem:[#allocation8 + $0x20] sm:$0xff]  ;;  %v1803_v51 = vld [vmem:[%s1762_s20] sm:$0xff]  ;;  %v407_v54 = vld [vmem:[#allocation7 + $0x278] sm:$0xff] }
  0xa3   : > { %1149 = vmatpush3.msra.mxu0 %v482_v7  ;;  %703 = vmatpush1.msra.mxu1 %v398_v8  ;;  %v328_v50 = vld [vmem:[#allocation7] sm:$0xff]  ;;  %v406_v52 = vld [vmem:[#allocation7 + $0x270] sm:$0xff]  ;;  %v405_v53 = vld [vmem:[#allocation7 + $0x268] sm:$0xff] }
  0xa4   : > { %1150 = vmatprep.subr.mxu0 %v1565_v2  ;;  %704 = vmatprep.subr.mxu1 %v394_v9  ;;  %v401_v55 = vld [vmem:[#allocation7 + $0x248] sm:$0xff]  ;;  %v400_v56 = vld [vmem:[#allocation7 + $0x240] sm:$0xff]  ;;  %v402_v57 = vld [vmem:[#allocation7 + $0x250] sm:$0xff] }
  0xa5   : > { %1151 = vmatpush3.msra.mxu0 %v477_v10  ;;  %705 = vmatpush1.msra.mxu1 %v393_v11  ;;  %v396_v58 = vld [vmem:[#allocation7 + $0x220] sm:$0xff]  ;;  %v395_v59 = vld [vmem:[#allocation7 + $0x218] sm:$0xff]  ;;  %v397_v60 = vld [vmem:[#allocation7 + $0x228] sm:$0xff] }
  0xa6   : > { %1152 = vmatprep.subr.mxu0 %v1565_v2  ;;  %706 = vmatprep.subr.mxu1 %v389_v12  ;;  %v391_v61 = vld [vmem:[#allocation7 + $0x1f8] sm:$0xff]  ;;  %v390_v62 = vld [vmem:[#allocation7 + $0x1f0] sm:$0xff]  ;;  %v392_v63 = vld [vmem:[#allocation7 + $0x200] sm:$0xff] }
  0xa7   : > { %1153 = vmatpush3.msra.mxu0 %v472_v13  ;;  %707 = vmatpush1.msra.mxu1 %v388_v14  ;;  %v386_v0 = vld [vmem:[#allocation7 + $0x1d0] sm:$0xff]  ;;  %v385_v3 = vld [vmem:[#allocation7 + $0x1c8] sm:$0xff]  ;;  %v387_v4 = vld [vmem:[#allocation7 + $0x1d8] sm:$0xff] }
  0xa8   : > { %1154 = vmatprep.subr.mxu0 %v1565_v2  ;;  %708 = vmatprep.subr.mxu1 %v384_v15  ;;  %v381_v5 = vld [vmem:[#allocation7 + $0x1a8] sm:$0xff]  ;;  %v380_v6 = vld [vmem:[#allocation7 + $0x1a0] sm:$0xff]  ;;  %v382_v7 = vld [vmem:[#allocation7 + $0x1b0] sm:$0xff] }
  0xa9   : > { %1155 = vmatpush3.msra.mxu0 %v467_v16  ;;  %709 = vmatpush1.msra.mxu1 %v383_v17  ;;  %v376_v8 = vld [vmem:[#allocation7 + $0x180] sm:$0xff]  ;;  %v375_v9 = vld [vmem:[#allocation7 + $0x178] sm:$0xff]  ;;  %v377_v10 = vld [vmem:[#allocation7 + $0x188] sm:$0xff] }
  0xaa   : > { %1156 = vmatprep.subr.mxu0 %v1565_v2  ;;  %710 = vmatprep.subr.mxu1 %v379_v18  ;;  %v371_v11 = vld [vmem:[#allocation7 + $0x158] sm:$0xff]  ;;  %v370_v12 = vld [vmem:[#allocation7 + $0x150] sm:$0xff]  ;;  %v372_v13 = vld [vmem:[#allocation7 + $0x160] sm:$0xff] }
  0xab   : > { %1157 = vmatpush3.msra.mxu0 %v462_v19  ;;  %711 = vmatpush1.msra.mxu1 %v378_v20  ;;  %v366_v14 = vld [vmem:[#allocation7 + $0x130] sm:$0xff]  ;;  %v365_v15 = vld [vmem:[#allocation7 + $0x128] sm:$0xff]  ;;  %v367_v16 = vld [vmem:[#allocation7 + $0x138] sm:$0xff] }
  0xac   : > { %1158 = vmatprep.subr.mxu0 %v1565_v2  ;;  %712 = vmatprep.subr.mxu1 %v374_v21  ;;  %v361_v17 = vld [vmem:[#allocation7 + $0x108] sm:$0xff]  ;;  %v360_v18 = vld [vmem:[#allocation7 + $0x100] sm:$0xff]  ;;  %v362_v19 = vld [vmem:[#allocation7 + $0x110] sm:$0xff] }
  0xad   : > { %1159 = vmatpush3.msra.mxu0 %v457_v22  ;;  %713 = vmatpush1.msra.mxu1 %v373_v23  ;;  %v356_v20 = vld [vmem:[#allocation7 + $0xe0] sm:$0xff]  ;;  %v355_v21 = vld [vmem:[#allocation7 + $0xd8] sm:$0xff]  ;;  %v357_v22 = vld [vmem:[#allocation7 + $0xe8] sm:$0xff] }
  0xae   : > { %1160 = vmatprep.subr.mxu0 %v1565_v2  ;;  %714 = vmatprep.subr.mxu1 %v369_v24  ;;  %v351_v23 = vld [vmem:[#allocation7 + $0xb8] sm:$0xff]  ;;  %v350_v24 = vld [vmem:[#allocation7 + $0xb0] sm:$0xff] }
  0xaf   : > { %1161 = vmatpush3.msra.mxu0 %v452_v25  ;;  %715 = vmatpush1.msra.mxu1 %v368_v26  ;;  %v352_v25 = vld [vmem:[#allocation7 + $0xc0] sm:$0xff]  ;;  %v346_v26 = vld [vmem:[#allocation7 + $0x90] sm:$0xff] }
  0xb0   : > { %1162 = vmatprep.subr.mxu0 %v1565_v2  ;;  %716 = vmatprep.subr.mxu1 %v364_v27  ;;  %v345_v27 = vld [vmem:[#allocation7 + $0x88] sm:$0xff] }
  0xb1   : > { %1163 = vmatpush3.msra.mxu0 %v447_v28  ;;  %717 = vmatpush1.msra.mxu1 %v363_v29  ;;  %v347_v28 = vld [vmem:[#allocation7 + $0x98] sm:$0xff]  ;;  %v341_v29 = vld [vmem:[#allocation7 + $0x68] sm:$0xff] }
  0xb2   : > { %1164 = vmatprep.subr.mxu0 %v1565_v2  ;;  %718 = vmatprep.subr.mxu1 %v359_v30  ;;  %v340_v30 = vld [vmem:[#allocation7 + $0x60] sm:$0xff] }
  0xb3   : > { %1165 = vmatpush3.msra.mxu0 %v442_v31  ;;  %719 = vmatpush1.msra.mxu1 %v358_v32  ;;  %v342_v31 = vld [vmem:[#allocation7 + $0x70] sm:$0xff]  ;;  %v336_v32 = vld [vmem:[#allocation7 + $0x40] sm:$0xff] }
  0xb4   : > { %1166 = vmatprep.subr.mxu0 %v1565_v2  ;;  %720 = vmatprep.subr.mxu1 %v354_v33  ;;  %v335_v33 = vld [vmem:[#allocation7 + $0x38] sm:$0xff] }
  0xb5   : > { %1167 = vmatpush3.msra.mxu0 %v437_v34  ;;  %721 = vmatpush1.msra.mxu1 %v353_v35  ;;  %v337_v34 = vld [vmem:[#allocation7 + $0x48] sm:$0xff]  ;;  %v331_v35 = vld [vmem:[#allocation7 + $0x18] sm:$0xff] }
  0xb6   : > { %1168 = vmatprep.subr.mxu0 %v1565_v2  ;;  %722 = vmatprep.subr.mxu1 %v349_v36  ;;  %v330_v36 = vld [vmem:[#allocation7 + $0x10] sm:$0xff] }
  0xb7   : > { %1169 = vmatpush3.msra.mxu0 %v432_v37  ;;  %723 = vmatpush1.msra.mxu1 %v348_v38  ;;  %v332_v37 = vld [vmem:[#allocation7 + $0x20] sm:$0xff] }
  0xb8   : > { %1170 = vmatprep.subr.mxu0 %v1565_v2  ;;  %724 = vmatprep.subr.mxu1 %v344_v39 }
  0xb9   : > { %1171 = vmatpush3.msra.mxu0 %v427_v40  ;;  %725 = vmatpush1.msra.mxu1 %v343_v41 }
  0xba   : > { %1172 = vmatprep.subr.mxu0 %v1565_v2  ;;  %726 = vmatprep.subr.mxu1 %v339_v42 }
  0xbb   : > { %1173 = vmatpush3.msra.mxu0 %v422_v43  ;;  %727 = vmatpush1.msra.mxu1 %v338_v44  ;;  %v912_v44 = vld [vmem:[#allocation10] sm:$0xff] }
  0xbc   : > { %1174 = vmatprep.subr.mxu0 %v1565_v2  ;;  %728 = vmatprep.subr.mxu1 %v334_v45 }
  0xbd   : > { %1175 = vmatpush3.msra.mxu0 %v417_v46  ;;  %729 = vmatpush1.msra.mxu1 %v333_v47 }
  0xbe   : > { %1176 = vmatprep.subr.mxu0 %v1565_v2  ;;  %730 = vmatprep.subr.mxu1 %v329_v48 }
  0xbf   : > { %1177 = vmatpush3.msra.mxu0 %v412_v49  ;;  %1178 = vmatprep.mubr.msk.f32.mxu0 %vm1566_vm0, %v1565_v2 }
  0xc0   : > { %731 = vmatpush1.msra.mxu1 %v328_v50  ;;  %764 = vmatprep.mubr.f32.mxu1 %v1565_v2  ;;  %v913_v50 = vld [vmem:[#allocation10 + $0x8] sm:$0xff] }
  0xc1   : > { %1179 = vmatmul.mubr.f32.vlgmr.msra.gmra.mxu0 %v1780_v1  ;;  %765 = vmatmul.mubr.f32.vlgmr.msra.gmra.mxu1 %v1803_v51 }
  0xc2   : > { %771 = vmatprep.subr.mxu0 %v406_v52  ;;  %1181 = vmatprep.subr.mxu1 %v1565_v2 }
  0xc3   : > { %772 = vmatpush1.msra.mxu0 %v405_v53  ;;  %1182 = vmatpush3.msra.mxu1 %v407_v54 }
  0xc4   : > { %773 = vmatprep.subr.mxu0 %v401_v55  ;;  %1183 = vmatprep.subr.mxu1 %v1565_v2 }
  0xc5   : > { %774 = vmatpush1.msra.mxu0 %v400_v56  ;;  %1184 = vmatpush3.msra.mxu1 %v402_v57 }
  0xc6   : > { %775 = vmatprep.subr.mxu0 %v396_v58  ;;  %1185 = vmatprep.subr.mxu1 %v1565_v2  ;;  %v916_v58 = vld [vmem:[#allocation10 + $0x20] sm:$0xff] }
  0xc7   : > { %776 = vmatpush1.msra.mxu0 %v395_v59  ;;  %1186 = vmatpush3.msra.mxu1 %v397_v60 }
  0xc8   : > { %777 = vmatprep.subr.mxu0 %v391_v61  ;;  %1187 = vmatprep.subr.mxu1 %v1565_v2  ;;  %v915_v61 = vld [vmem:[#allocation10 + $0x18] sm:$0xff] }
  0xc9   : > { %778 = vmatpush1.msra.mxu0 %v390_v62  ;;  %1188 = vmatpush3.msra.mxu1 %v392_v63 }
  0xca   : > { %779 = vmatprep.subr.mxu0 %v386_v0  ;;  %1189 = vmatprep.subr.mxu1 %v1565_v2 }
  0xcb   : > { %780 = vmatpush1.msra.mxu0 %v385_v3  ;;  %1190 = vmatpush3.msra.mxu1 %v387_v4 }
  0xcc   : > { %781 = vmatprep.subr.mxu0 %v381_v5  ;;  %1191 = vmatprep.subr.mxu1 %v1565_v2  ;;  %v914_v5 = vld [vmem:[#allocation10 + $0x10] sm:$0xff] }
  0xcd   : > { %782 = vmatpush1.msra.mxu0 %v380_v6  ;;  %1192 = vmatpush3.msra.mxu1 %v382_v7 }
  0xce   : > { %783 = vmatprep.subr.mxu0 %v376_v8  ;;  %1193 = vmatprep.subr.mxu1 %v1565_v2 }
  0xcf   : > { %784 = vmatpush1.msra.mxu0 %v375_v9  ;;  %1194 = vmatpush3.msra.mxu1 %v377_v10 }
  0xd0   : > { %785 = vmatprep.subr.mxu0 %v371_v11  ;;  %1195 = vmatprep.subr.mxu1 %v1565_v2 }
  0xd1   : > { %786 = vmatpush1.msra.mxu0 %v370_v12  ;;  %1196 = vmatpush3.msra.mxu1 %v372_v13 }
  0xd2   : > { %787 = vmatprep.subr.mxu0 %v366_v14  ;;  %1197 = vmatprep.subr.mxu1 %v1565_v2 }
  0xd3   : > { %788 = vmatpush1.msra.mxu0 %v365_v15  ;;  %1198 = vmatpush3.msra.mxu1 %v367_v16 }
  0xd4   : > { %789 = vmatprep.subr.mxu0 %v361_v17  ;;  %1199 = vmatprep.subr.mxu1 %v1565_v2 }
  0xd5   : > { %790 = vmatpush1.msra.mxu0 %v360_v18  ;;  %1200 = vmatpush3.msra.mxu1 %v362_v19 }
  0xd6   : > { %791 = vmatprep.subr.mxu0 %v356_v20  ;;  %1201 = vmatprep.subr.mxu1 %v1565_v2 }
  0xd7   : > { %792 = vmatpush1.msra.mxu0 %v355_v21  ;;  %1202 = vmatpush3.msra.mxu1 %v357_v22 }
  0xd8   : > { %793 = vmatprep.subr.mxu0 %v351_v23  ;;  %1203 = vmatprep.subr.mxu1 %v1565_v2 }
  0xd9   : > { %794 = vmatpush1.msra.mxu0 %v350_v24  ;;  %1204 = vmatpush3.msra.mxu1 %v352_v25 }
  0xda   : > { %795 = vmatprep.subr.mxu0 %v346_v26  ;;  %1205 = vmatprep.subr.mxu1 %v1565_v2 }
  0xdb   : > { %796 = vmatpush1.msra.mxu0 %v345_v27  ;;  %1206 = vmatpush3.msra.mxu1 %v347_v28 }
  0xdc   : > { %797 = vmatprep.subr.mxu0 %v341_v29  ;;  %1207 = vmatprep.subr.mxu1 %v1565_v2 }
  0xdd   : > { %798 = vmatpush1.msra.mxu0 %v340_v30  ;;  %1208 = vmatpush3.msra.mxu1 %v342_v31 }
  0xde   : > { %799 = vmatprep.subr.mxu0 %v336_v32  ;;  %1209 = vmatprep.subr.mxu1 %v1565_v2 }
  0xdf   : > { %800 = vmatpush1.msra.mxu0 %v335_v33  ;;  %1210 = vmatpush3.msra.mxu1 %v337_v34 }
  0xe0   : > { %801 = vmatprep.subr.mxu0 %v331_v35  ;;  %1211 = vmatprep.subr.mxu1 %v1565_v2 }
  0xe1   : > { %802 = vmatpush1.msra.mxu0 %v330_v36  ;;  %835 = vmatprep.mubr.f32.mxu0 %v1565_v2 }
  0xe2   : > { %1212 = vmatpush3.msra.mxu1 %v332_v37  ;;  %1213 = vmatprep.mubr.msk.f32.mxu1 %vm1566_vm0, %v1565_v2 }
  0xe3   : > { %836 = vmatmul.mubr.f32.vlgmr.msra.gmra.mxu0 %v1803_v51  ;;  %1214 = vmatmul.mubr.f32.vlgmr.msra.gmra.mxu1 %v1803_v51 }
 0x15e   : > { %v554_v38 = vpop.f32.mrf.mxu0 }
 0x160   : > { %v625_v39 = vpop.f32.mrf.mxu1  ;;  %v556_v40 = vpop.f32.mrf.mxu0 }
 0x162   : > { %v627_v41 = vpop.f32.mrf.mxu1 }
 0x181   : > { %v696_v42 = vpop.f32.mrf.mxu0  ;;  %v766_v43 = vpop.f32.mrf.mxu1 }
 0x182   : > { %v767_v45 = vadd.f32 %v766_v43, %v554_v38 }
 0x183   : > { %v1180_v46 = vpop.f32.mrf.mxu0  ;;  %v768_v49 = vpop.f32.mrf.mxu1 }
 0x184   : > { %v917_v47 = vadd.f32 %v912_v44, %v767_v45  ;;  %v769_v2 = vadd.f32 %v768_v49, %v556_v40 }
 0x186   : > { %v1104_v48 = vmul.f32 -1.442695, %v917_v47  ;;  %v918_v52 = vadd.f32 %v913_v50, %v769_v2 }
 0x188   : > { %1314 = vpow2.f32 %v1104_v48  ;;  %v1105_v53 = vmul.f32 -1.442695, %v918_v52 }
 0x18a   : > { %1316 = vpow2.f32 %v1105_v53 }
 0x195   : > { %v1315_v51 = vpop.eup %1314 }
 0x196   : > { %v925_v54 = vadd.f32 1.0, %v1315_v51 }
 0x197   : > { %v1317_v55 = vpop.eup %1316 }
 0x198   : > { %1318 = vrcp.f32 %v925_v54  ;;  %v931_v63 = vadd.f32 1.0, %v1317_v55 }
 0x1a3   : > { %v837_v56 = vpop.f32.mrf.mxu0  ;;  %v908_v57 = vpop.f32.mrf.mxu1 }
 0x1a4   : > { %v909_v59 = vadd.f32 %v908_v57, %v696_v42  ;;  %v838_v0 = vadd.f32 %v837_v56, %v625_v39 }
 0x1a5   : > { %v839_v60 = vpop.f32.mrf.mxu0  ;;  %v1215_v62 = vpop.f32.mrf.mxu1 }
 0x1a6   : > { %v921_v3 = vadd.f32 %v916_v58, %v909_v59  ;;  %v840_v4 = vadd.f32 %v839_v60, %v627_v41  ;;  %v1319_v7 = vpop.eup %1318 }
 0x1a8   : > { %937 = vst [vmem:[%s1776_s1] sm:$0xff] %v921_v3  ;;  %v920_v6 = vadd.f32 %v915_v61, %v840_v4 }
 0x1a9   : > { %1469 = shalt.err (!%p1466_p13)
}
 0x1aa   : > { %s1470_s29 = scalar_lea.hbm %s1836_s8, 128  ;;  %s1474_s19 = scalar_lea.hbm %s1896_s5, 1024 }
 0x1ab   : > { %p1471_p1 = scmp.ne.s32.totalorder %s1836_s8, %s1470_s29  ;;  %p1475_p6 = scmp.lt.s32.totalorder %s1836_s8, %s1896_s5 }
 0x1ac   : > { %p1476_p5 = scmp.lt.s32.totalorder %s1474_s19, %s1470_s29 }
 0x1ad   : > { %p1472_p3 = pnand %p1471_p1, %p1919_p10 }
 0x1ae   : > { %p1477_p8 = por %p1476_p5, %p1475_p6 }
 0x1af   : > { %p1473_p4 = pneg %p1472_p3 }
 0x1b1   : > { %p1478_p7 = pnand %p1477_p8, %p1473_p4 }
 0x1b3   : > { %1481 = shalt.err (!%p1478_p7)
}
 0x1b4   : > { %1234 = dma.vmem_to_hbm [thread:$0]  (%p1919_p10), %s1838_s14, 128, %s1836_s8, %s944_s7   ;;  %1320 = vrcp.f32 %v931_v63  ;;  %v919_v8 = vadd.f32 %v914_v5, %v838_v0  ;;  %v934_v9 = vmul.f32 %v1319_v7, %v920_v6 }
 0x1b5   : > { %s1568_s28 = smov [#allocation12]   ;;  %p1920_p10 = scmp.eq.s32.totalorder %s1625_s27, 7 }
 0x1b6   : > { %v935_v10 = vadd.f32 %v934_v9, %v919_v8  ;;  %s968_s26 = sshll.u32 %s1568_s28, 4  ;;  %s969_s26 = int_to_ptr.vmem [resolvable:$true] %s968_s26 }
 0x1b7   : > { %s1482_s16 = scalar_lea.vmem %s969_s26, 128  ;;  %p1489_p9 = scmp.lt.s32.totalorder %s969_s26, %s969_s26 }
 0x1b8   : > { %1322 = vtanh.f32 %v935_v10  ;;  %p1483_p0 = scmp.ne.s32.totalorder %s969_s26, %s1482_s16  ;;  %p1490_p11 = scmp.lt.s32.totalorder %s1482_s16, %s1482_s16 }
 0x1ba   : > { %p1484_p12 = pnand %p1483_p0, %p1920_p10  ;;  %p1491_p13 = por %p1490_p11, %p1489_p9 }
 0x1bc   : > { %p1485_p2 = pneg %p1484_p12 }
 0x1be   : > { %p1492_p1 = pnand %p1491_p13, %p1485_p2 }
 0x1c1   : > { %v1321_v11 = vpop.eup %1320 }
 0x1c2   : > { %v938_v12 = vsub.f32 1.0, %v1321_v11  ;;  %v940_v15 = vmul.f32 %v1321_v11, %v1780_v1 }
 0x1c5   : > { %v1323_v13 = vpop.eup %1322 }
 0x1c6   : > { %v939_v14 = vmul.f32 %v1323_v13, %v938_v12 }
 0x1c8   : > { %v941_v16 = vadd.f32 %v940_v15, %v939_v14 }
 0x1ca   : > { %942 = vst [vmem:[#allocation12] sm:$0xff] %v941_v16 }
 0x1cb   : > { %1495 = shalt.err (!%p1492_p1)
}
 0x1cc   : > { %p1921_p3 = pmov %p1920_p10 }
 0x1ce   : > { %1236 = dma.vmem_to_hbm [thread:$0]  (%p1921_p3), %s969_s26, 128, %s1897_s6, [#allocation13]  }
 0x1cf   : > { %p1922_p4 = pmov %p1921_p3 }
 0x1d0   : > { %p1923_p6 = pmov %p1921_p3 }
 0x1d1   : > { %1535 = dma.done.wait (%p1922_p4), [#allocation13], 128  }
 0x1d2   : > { %1537 = vsyncadd (%p1923_p6), [#allocation13], 4294967168 }
 0x1d3 PF: > { %p1272_p5 = scmp.ge.s32.totalorder %s1556_s24, 2  ;;  %s984_s8 = sand.u32 1, %s1544_s21  }
 0x1d4   : > { %p1924_p8 = scmp.ne.s32.totalorder %s1910_s17, 0  ;;  %s985_s7 = scalar_lea.sflag [#allocation4], %s984_s8 }
 0x1d6   : > { %p1258_p7 = pnand %p1272_p5, %p1924_p8 }
 0x1d8   : > { %p1259_p0 = pneg %p1258_p7 }
 0x1da   : > { %1539 = dma.done.wait (%p1259_p0), %s985_s7, 128  }
 0x1db   : > { %1541 = vsyncadd (%p1259_p0), %s985_s7, 4294967168  ;;  %p23_p10 = scmp.ge.s32.totalorder %s1693_s9, 10   ;;  %s1925_s21 = smov %s1548_s22 }
 0x1dc   : > { %s1926_s22 = smov %s1552_s23  ;;  %s1927_s23 = smov %s1704_s12 }
 0x1dd   : > { %s1928_s24 = smov %s1693_s9  ;;  %25 = sbr.rel (!%p23_p10) target bundleno = 10 (0xa), region = 113 }
 0x1e2   :  { %990 = vsyncpa [#allocation3], 1 }
 0x1e3   :  { %992 = vsyncpa [#allocation3 + $0x1], 1 }
 0x1e4   :  { %993 = vsyncpa [#allocation6], 1 }
 0x1e5   :  { %994 = vsyncpa [#allocation9], 1 }
 0x1e6   :  { %995 = vsyncpa [#allocation4], 1 }
 0x1e7   :  { %997 = vsyncpa [#allocation4 + $0x1], 1 }
 0x1e8   :  { %998 = vsyncpa [#allocation13], 1 }

</bundles_post_ra>
